<compile_context>
chip_gen: v7x
topology: tpu7x:2x2x1
jax: 0.10.0
libtpu: 0.0.40
codegen_flags: <defaults>
</compile_context>

<pallas_src>
import math
from functools import partial

import numpy as np
import jax
import jax.numpy as jnp
from jax.experimental import pallas as pl
from jax.experimental.pallas import tpu as pltpu


# ----------------------------------------------------------------------------
# Small helpers
# ----------------------------------------------------------------------------

def _round_up(x, m):
    return ((x + m - 1) // m) * m


_VMEM_INFO_CACHE = None


def _vmem_budget():
    """Returns (usable_vmem_budget_bytes, physical_vmem_bytes), cached."""
    global _VMEM_INFO_CACHE
    if _VMEM_INFO_CACHE is not None:
        return _VMEM_INFO_CACHE
    phys = 128 * 1024 * 1024
    try:
        phys = int(getattr(pltpu.get_tpu_info(), "vmem_capacity_bytes", phys))
    except Exception:
        pass
    if phys <= 64 * 1024 * 1024:
        # v7x-class core (64 MiB / TC): leave headroom for compiler scratch.
        budget = min(max(phys - 16 * 1024 * 1024, 32 * 1024 * 1024),
                     52 * 1024 * 1024)
    else:
        # v5e / v6e (128 MiB): use most of it, keep internal headroom.
        budget = min(phys - 28 * 1024 * 1024, 100 * 1024 * 1024)
    _VMEM_INFO_CACHE = (budget, phys)
    return _VMEM_INFO_CACHE


# ----------------------------------------------------------------------------
# Pallas kernels: y = fc2(relu(fc1(x)))  [+ optional fused residual + LN]
# ----------------------------------------------------------------------------

def _ffn_epilogue(y, x_ref, g_ref, bt_ref, o_ref, *, fuse_ln, inv_dm, eps):
    # y is the f32 FFN output tile (bias already added).  With fuse_ln the
    # residual add + LayerNorm run here, on idle VPU/XLU/EUP slots.  Padded
    # d_model lanes are exactly zero (zero-padded x/W/b), so sum / sum-of-
    # squares over the padded width equal the sums over the real d_model.
    if fuse_ln:
        y = y + x_ref[...].astype(jnp.float32)
        mean = jnp.sum(y, axis=-1, keepdims=True) * inv_dm
        var = jnp.sum(y * y, axis=-1, keepdims=True) * inv_dm - mean * mean
        y = g_ref[...] * (y - mean) * jax.lax.rsqrt(var + eps) + bt_ref[...]
    o_ref[...] = y.astype(o_ref.dtype)


def _ffn_single_kernel(x_ref, w1_ref, b1_ref, w2_ref, b2_ref, g_ref, bt_ref,
                       o_ref, *, fuse_ln, inv_dm, eps):
    # Single reduction step (full d_ff resident in VMEM): no scratch, no
    # pl.when.  Weights are grid-invariant -> DMA'd once, reused per row tile.
    h = jnp.dot(x_ref[...], w1_ref[...], preferred_element_type=jnp.float32)
    h = jnp.maximum(h + b1_ref[...], 0.0)
    y = jnp.dot(h.astype(w2_ref.dtype), w2_ref[...],
                preferred_element_type=jnp.float32) + b2_ref[...]
    _ffn_epilogue(y, x_ref, g_ref, bt_ref, o_ref,
                  fuse_ln=fuse_ln, inv_dm=inv_dm, eps=eps)


def _ffn_tiled_kernel(x_ref, w1_ref, b1_ref, w2_ref, b2_ref, g_ref, bt_ref,
                      o_ref, acc_ref, *, fuse_ln, inv_dm, eps):
    # Grid: (row_tiles, d_ff_tiles); axis 1 is the accumulated reduction axis.
    k = pl.program_id(1)

    @pl.when(k == 0)
    def _():
        acc_ref[...] = jnp.zeros_like(acc_ref)

    h = jnp.dot(x_ref[...], w1_ref[...], preferred_element_type=jnp.float32)
    h = jnp.maximum(h + b1_ref[...], 0.0)
    acc_ref[...] += jnp.dot(h.astype(w2_ref.dtype), w2_ref[...],
                            preferred_element_type=jnp.float32)

    @pl.when(k == pl.num_programs(1) - 1)
    def _():
        _ffn_epilogue(acc_ref[...] + b2_ref[...], x_ref, g_ref, bt_ref, o_ref,
                      fuse_ln=fuse_ln, inv_dm=inv_dm, eps=eps)


# ----------------------------------------------------------------------------
# Host-side wrapper
# ----------------------------------------------------------------------------

def make_ffn_params(w1, b1, w2, b2, gamma=None, beta=None, *,
                    compute_dtype=jnp.float32, dm_align=128, ff_align=128):
    """Pre-pad (lane-dense, MXU-aligned) and pre-cast the FFN weights once.

    Weights are stored [in, out] (matching x @ W + b).  gamma/beta are the
    LayerNorm params of the post-FFN norm (used only when fusing).
    """
    d_model, d_ff = w1.shape
    dm_p = _round_up(d_model, dm_align)
    dff_p = _round_up(d_ff, ff_align)
    if gamma is None:
        gamma = jnp.ones((d_model,), jnp.float32)
    if beta is None:
        beta = jnp.zeros((d_model,), jnp.float32)
    pad_dm, pad_ff = dm_p - d_model, dff_p - d_ff
    cdtype = np.dtype(compute_dtype)
    return {
        "w1": jnp.pad(w1.astype(cdtype), ((0, pad_dm), (0, pad_ff))),
        "b1": jnp.pad(b1.astype(jnp.float32), (0, pad_ff)).reshape(1, dff_p),
        "w2": jnp.pad(w2.astype(cdtype), ((0, pad_ff), (0, pad_dm))),
        "b2": jnp.pad(b2.astype(jnp.float32), (0, pad_dm)).reshape(1, dm_p),
        "gamma": jnp.pad(gamma.astype(jnp.float32), (0, pad_dm)).reshape(1, dm_p),
        "beta": jnp.pad(beta.astype(jnp.float32), (0, pad_dm)).reshape(1, dm_p),
        "d_model": d_model, "d_ff": d_ff, "dm_p": dm_p, "dff_p": dff_p,
        "compute_dtype": cdtype,
    }


def ffn_pallas(x, pf, *, fuse_residual_ln=False, eps=1e-5,
               row_tile=None, ff_tile=None):
    """Pallas FFN:  fc2(relu(fc1(x)))  [optionally LN(x + FFN(x)) fused]."""
    orig_shape = x.shape
    d_model = pf["d_model"]
    dm_p, dff_p = pf["dm_p"], pf["dff_p"]
    cdtype = pf["compute_dtype"]
    rows = int(math.prod(orig_shape[:-1])) if len(orig_shape) > 1 else 1

    cbytes = cdtype.itemsize
    obytes = np.dtype(x.dtype).itemsize
    budget, phys = _vmem_budget()
    small_vmem = phys <= 64 * 1024 * 1024

    # --- row tile: native sublane pack (16 for bf16, 8 for f32) -------------
    sub = 16 if cbytes == 2 else 8
    if row_tile is None:
        row_tile = 256 if small_vmem else 512
    tr = min(_round_up(row_tile, sub), _round_up(rows, sub))
    # v7x has 2 TensorCores: give the "parallel" rows axis >= 2 blocks.
    if small_vmem and rows > sub and -(-rows // tr) < 2:
        tr = _round_up(-(-rows // 2), sub)
    rows_p = _round_up(rows, tr)
    n_row_tiles = rows_p // tr

    # --- d_ff tile: collapse the reduction axis whenever the weights fit ----
    def vmem_need(tf, nk):
        return ((2 * tr * dm_p * (cbytes + obytes))          # x + out blocks
                + 2 * 2 * dm_p * tf * cbytes                 # W1 + W2 (cons. 2x)
                + 2 * 8 * tf * 4 + 2 * 3 * 8 * dm_p * 4      # biases, gamma, beta
                + (0 if nk == 1 else tr * dm_p * 4)          # f32 accumulator
                + (2 << 20))                                 # slop

    if ff_tile is not None:
        tf = min(_round_up(ff_tile, 128), dff_p)
        if dff_p % tf:
            raise ValueError("ff_tile must divide the padded d_ff")
    elif vmem_need(dff_p, 1) <= budget:
        tf = dff_p
    else:
        tf = dff_p
        while tf % 256 == 0 and vmem_need(tf, 2) > budget:
            tf //= 2
    nk = dff_p // tf
    vmem_limit = int(min(max(int(budget), int(vmem_need(tf, nk))), phys))

    # --- per-call work on x only (weights padded / cast once up front) ------
    x2d = x.reshape(rows, d_model)
    if rows_p != rows or dm_p != d_model:
        x2d = jnp.pad(x2d, ((0, rows_p - rows), (0, dm_p - d_model)))
    x2d = x2d.astype(cdtype)

    kern_kwargs = dict(fuse_ln=fuse_residual_ln, inv_dm=1.0 / d_model, eps=eps)
    cost = pl.CostEstimate(
        flops=int(4 * rows_p * dm_p * dff_p),
        transcendentals=int(rows_p if fuse_residual_ln else 0),
        bytes_accessed=int(rows_p * dm_p * (cbytes + obytes)
                           + 2 * dm_p * dff_p * cbytes))
    args = (x2d, pf["w1"], pf["b1"], pf["w2"], pf["b2"],
            pf["gamma"], pf["beta"])
    out_shape = jax.ShapeDtypeStruct((rows_p, dm_p), x.dtype)

    if nk == 1:
        def run_single(single_buffer_weights):
            mode = pl.Buffered(1) if single_buffer_weights else None

            def inv_spec(shape):
                if mode is None:
                    return pl.BlockSpec(shape, lambda i: (0, 0))
                return pl.BlockSpec(shape, lambda i: (0, 0),
                                    pipeline_mode=mode)

            grid_spec = pltpu.PrefetchScalarGridSpec(
                num_scalar_prefetch=0,
                grid=(n_row_tiles,),
                in_specs=[
                    pl.BlockSpec((tr, dm_p), lambda i: (i, 0)),  # x rows
                    inv_spec((dm_p, dff_p)),                     # W1 (invariant)
                    inv_spec((1, dff_p)),                        # b1
                    inv_spec((dff_p, dm_p)),                     # W2 (invariant)
                    inv_spec((1, dm_p)),                         # b2
                    inv_spec((1, dm_p)),                         # gamma
                    inv_spec((1, dm_p)),                         # beta
                ],
                out_specs=pl.BlockSpec((tr, dm_p), lambda i: (i, 0)),
            )
            return pl.pallas_call(
                partial(_ffn_single_kernel, **kern_kwargs),
                out_shape=out_shape,
                grid_spec=grid_spec,
                compiler_params=pltpu.CompilerParams(
                    dimension_semantics=("parallel",),
                    vmem_limit_bytes=vmem_limit),
                cost_estimate=cost,
            )(*args)

        try:
            # Grid-invariant weights, single-buffered (halves their VMEM).
            out2d = run_single(True)
        except Exception:
            # Fallback if this jax build rejects Buffered(1).
            out2d = run_single(False)
    else:
        grid_spec = pltpu.PrefetchScalarGridSpec(
            num_scalar_prefetch=0,
            grid=(n_row_tiles, nk),
            in_specs=[
                pl.BlockSpec((tr, dm_p), lambda i, k: (i, 0)),   # x rows
                pl.BlockSpec((dm_p, tf), lambda i, k: (0, k)),   # W1 slice
                pl.BlockSpec((1, tf), lambda i, k: (0, k)),      # b1 slice
                pl.BlockSpec((tf, dm_p), lambda i, k: (k, 0)),   # W2 slice
                pl.BlockSpec((1, dm_p), lambda i, k: (0, 0)),    # b2
                pl.BlockSpec((1, dm_p), lambda i, k: (0, 0)),    # gamma
                pl.BlockSpec((1, dm_p), lambda i, k: (0, 0)),    # beta
            ],
            out_specs=pl.BlockSpec((tr, dm_p), lambda i, k: (i, 0)),
            scratch_shapes=[pltpu.VMEM((tr, dm_p), jnp.float32)],
        )
        out2d = pl.pallas_call(
            partial(_ffn_tiled_kernel, **kern_kwargs),
            out_shape=out_shape,
            grid_spec=grid_spec,
            compiler_params=pltpu.CompilerParams(
                dimension_semantics=("parallel", "arbitrary"),
                vmem_limit_bytes=vmem_limit),
            cost_estimate=cost,
        )(*args)

    if rows_p != rows or dm_p != d_model:
        out2d = out2d[:rows, :d_model]
    return out2d.reshape(orig_shape)


# ----------------------------------------------------------------------------
# Plain-JAX Transformer glue (matches the PyTorch module's forward semantics)
# ----------------------------------------------------------------------------

PAD_IDX = 0  # '<pad>' is the first special token in create_vocab
_MIN_PALLAS_MACS = 1 << 21  # below ~2M MACs the fused XLA path wins


def _pallas_worthwhile(rows, d_model, d_ff, force=False):
    return force or rows * d_model * d_ff >= _MIN_PALLAS_MACS


def _linear(x, w, b):
    return jnp.dot(x, w) + b


def _layer_norm(x, gamma, beta, eps=1e-5):
    mean = jnp.mean(x, axis=-1, keepdims=True)
    var = jnp.mean(jnp.square(x - mean), axis=-1, keepdims=True)
    return gamma * (x - mean) * jax.lax.rsqrt(var + eps) + beta


def _ffn_reference(x, w1, b1, w2, b2):
    return jnp.dot(jnp.maximum(jnp.dot(x, w1) + b1, 0.0), w2) + b2


def _multi_head_attention(p, q_in, k_in, v_in, num_heads, mask=None):
    bsz, q_len, d_model = q_in.shape
    d_k = d_model // num_heads

    def split_heads(t):
        return t.reshape(bsz, -1, num_heads, d_k).transpose(0, 2, 1, 3)

    q = split_heads(_linear(q_in, p["wq"], p["bq"]))
    k = split_heads(_linear(k_in, p["wk"], p["bk"]))
    v = split_heads(_linear(v_in, p["wv"], p["bv"]))

    scores = jnp.einsum("bhqd,bhkd->bhqk", q, k) / math.sqrt(d_k)
    if mask is not None:
        scores = jnp.where(mask, scores, -1e9)
    probs = jax.nn.softmax(scores, axis=-1)
    out = jnp.einsum("bhqk,bhkd->bhqd", probs, v)
    out = out.transpose(0, 2, 1, 3).reshape(bsz, q_len, d_model)
    return _linear(out, p["wo"], p["bo"])


def _ffn_block(x, lp, norm_g, norm_b, use_pallas, force_pallas):
    """LN(x + FFN(x)) — fused Pallas kernel when worthwhile, else plain JAX."""
    f = lp["ffn"]
    pf = lp.get("ffn_pallas")
    rows = int(math.prod(x.shape[:-1]))
    if (use_pallas and pf is not None
            and _pallas_worthwhile(rows, f["w1"].shape[0], f["w1"].shape[1],
                                   force_pallas)):
        return ffn_pallas(x, pf, fuse_residual_ln=True)
    ff = _ffn_reference(x, f["w1"], f["b1"], f["w2"], f["b2"])
    return _layer_norm(x + ff, norm_g, norm_b)


def _encoder_layer(p, x, mask, num_heads, use_pallas, force_pallas):
    attn = _multi_head_attention(p["self_attn"], x, x, x, num_heads, mask)
    x = _layer_norm(x + attn, p["norm1_g"], p["norm1_b"])
    return _ffn_block(x, p, p["norm2_g"], p["norm2_b"], use_pallas,
                      force_pallas)


def _decoder_layer(p, x, enc_out, src_mask, trg_mask, num_heads, use_pallas,
                   force_pallas):
    attn = _multi_head_attention(p["self_attn"], x, x, x, num_heads, trg_mask)
    x = _layer_norm(x + attn, p["norm1_g"], p["norm1_b"])
    attn = _multi_head_attention(p["cross_attn"], x, enc_out, enc_out,
                                 num_heads, src_mask)
    x = _layer_norm(x + attn, p["norm2_g"], p["norm2_b"])
    return _ffn_block(x, p, p["norm3_g"], p["norm3_b"], use_pallas,
                      force_pallas)


def _generate_mask(src, trg):
    src_mask = (src != PAD_IDX)[:, None, None, :]           # (B,1,1,Ss)
    trg_pad = (trg != PAD_IDX)[:, None, :, None]            # (B,1,St,1)
    seq_len = trg.shape[1]
    nopeak = jnp.tril(jnp.ones((seq_len, seq_len), dtype=bool))
    trg_mask = trg_pad & nopeak[None, None, :, :]            # (B,1,St,St)
    return src_mask, trg_mask


def transformer_forward(params, src, trg, *, num_heads, use_pallas_ffn=True,
                        force_pallas_ffn=False):
    """Mirrors Transformer.forward (dropout is identity: eval mode)."""
    src_mask, trg_mask = _generate_mask(src, trg)
    d_model = params["enc_emb"].shape[1]
    scale = jnp.sqrt(jnp.float32(d_model))
    pe = params["pe"]  # (max_len, 1, d_model), same buffer layout as PyTorch
    # NOTE: faithfully mirrors the PyTorch module, which indexes the PE buffer
    # with the *batch* dimension of a batch-first input (pe[:x.size(0)]).
    src_emb = params["enc_emb"][src] * scale + pe[: src.shape[0]]
    trg_emb = params["dec_emb"][trg] * scale + pe[: trg.shape[0]]

    enc = src_emb
    for lp in params["encoder_layers"]:
        enc = _encoder_layer(lp, enc, src_mask, num_heads, use_pallas_ffn,
                             force_pallas_ffn)

    dec = trg_emb
    for lp in params["decoder_layers"]:
        dec = _decoder_layer(lp, dec, enc, src_mask, trg_mask, num_heads,
                             use_pallas_ffn, force_pallas_ffn)

    return _linear(dec, params["fc_out_w"], params["fc_out_b"])


def prepare_transformer_params(params, compute_dtype=jnp.float32):
    """Pre-pad / pre-cast every layer's FFN weights (+ post-FFN LayerNorm
    params) ONCE so the Pallas kernel never re-pads weights per forward call."""
    out = dict(params)
    enc = []
    for lp in params["encoder_layers"]:
        lp = dict(lp)
        f = lp["ffn"]
        lp["ffn_pallas"] = make_ffn_params(
            f["w1"], f["b1"], f["w2"], f["b2"],
            gamma=lp["norm2_g"], beta=lp["norm2_b"],
            compute_dtype=compute_dtype)
        enc.append(lp)
    dec = []
    for lp in params["decoder_layers"]:
        lp = dict(lp)
        f = lp["ffn"]
        lp["ffn_pallas"] = make_ffn_params(
            f["w1"], f["b1"], f["w2"], f["b2"],
            gamma=lp["norm3_g"], beta=lp["norm3_b"],
            compute_dtype=compute_dtype)
        dec.append(lp)
    out["encoder_layers"] = enc
    out["decoder_layers"] = dec
    return out


# ----------------------------------------------------------------------------
# Parameter construction (deterministic, mimicking nn.Linear / nn.Embedding)
# ----------------------------------------------------------------------------

def _make_positional_encoding(d_model, max_len):
    position = jnp.arange(max_len, dtype=jnp.float32)[:, None]
    div_term = jnp.exp(jnp.arange(0, d_model, 2, dtype=jnp.float32)
                       * (-math.log(10000.0) / d_model))
    pe = jnp.zeros((max_len, d_model), dtype=jnp.float32)
    pe = pe.at[:, 0::2].set(jnp.sin(position * div_term))
    pe = pe.at[:, 1::2].set(jnp.cos(position * div_term))
    return pe[:, None, :]


def _init_linear(key, fan_in, fan_out):
    kw, kb = jax.random.split(key)
    bound = 1.0 / math.sqrt(fan_in)
    w = jax.random.uniform(kw, (fan_in, fan_out), jnp.float32, -bound, bound)
    b = jax.random.uniform(kb, (fan_out,), jnp.float32, -bound, bound)
    return w, b


def _init_mha(key, d_model):
    p = {}
    for name, k in zip(("q", "k", "v", "o"), jax.random.split(key, 4)):
        w, b = _init_linear(k, d_model, d_model)
        p["w" + name], p["b" + name] = w, b
    return p


def _init_ffn(key, d_model, d_ff):
    k1, k2 = jax.random.split(key)
    w1, b1 = _init_linear(k1, d_model, d_ff)
    w2, b2 = _init_linear(k2, d_ff, d_model)
    return {"w1": w1, "b1": b1, "w2": w2, "b2": b2}


def _init_encoder_layer(key, d_model, d_ff):
    k1, k2 = jax.random.split(key)
    return {
        "self_attn": _init_mha(k1, d_model),
        "ffn": _init_ffn(k2, d_model, d_ff),
        "norm1_g": jnp.ones((d_model,)), "norm1_b": jnp.zeros((d_model,)),
        "norm2_g": jnp.ones((d_model,)), "norm2_b": jnp.zeros((d_model,)),
    }


def _init_decoder_layer(key, d_model, d_ff):
    k1, k2, k3 = jax.random.split(key, 3)
    return {
        "self_attn": _init_mha(k1, d_model),
        "cross_attn": _init_mha(k2, d_model),
        "ffn": _init_ffn(k3, d_model, d_ff),
        "norm1_g": jnp.ones((d_model,)), "norm1_b": jnp.zeros((d_model,)),
        "norm2_g": jnp.ones((d_model,)), "norm2_b": jnp.zeros((d_model,)),
        "norm3_g": jnp.ones((d_model,)), "norm3_b": jnp.zeros((d_model,)),
    }


def init_transformer(key, src_vocab, trg_vocab, d_model, num_layers, d_ff,
                     max_len):
    keys = jax.random.split(key, 4 + 2 * num_layers)
    fc_w, fc_b = _init_linear(keys[2], d_model, trg_vocab)
    return {
        "enc_emb": jax.random.normal(keys[0], (src_vocab, d_model), jnp.float32),
        "dec_emb": jax.random.normal(keys[1], (trg_vocab, d_model), jnp.float32),
        "pe": _make_positional_encoding(d_model, max_len),
        "encoder_layers": [_init_encoder_layer(keys[4 + i], d_model, d_ff)
                           for i in range(num_layers)],
        "decoder_layers": [_init_decoder_layer(keys[4 + num_layers + i],
                                               d_model, d_ff)
                           for i in range(num_layers)],
        "fc_out_w": fc_w,
        "fc_out_b": fc_b,
    }


# ----------------------------------------------------------------------------
# Tests / demo
# ----------------------------------------------------------------------------

if __name__ == "__main__":
    src_vocab, trg_vocab = 50, 54
    d_model, num_heads, num_layers, d_ff = 32, 4, 2, 64
    max_seq_length = 64
    batch, src_len, trg_len = 2, 10, 8

    root = jax.random.PRNGKey(0)
    k_params, k_src, k_trg, k_x, k_m = jax.random.split(root, 5)

    params = init_transformer(k_params, src_vocab, trg_vocab, d_model,
                              num_layers, d_ff, max_seq_length)

    src = jax.random.randint(k_src, (batch, src_len), 1, src_vocab)
    trg = jax.random.randint(k_trg, (batch, trg_len), 1, trg_vocab)
    src = src.at[1, 7:].set(PAD_IDX)   # exercise the padding masks
    trg = trg.at[1, 6:].set(PAD_IDX)

    # --- 1) Plain (un-fused) FFN kernel vs reference, toy shapes ------------
    ffn_p = params["encoder_layers"][0]["ffn"]
    x_small = jax.random.normal(k_x, (batch, src_len, d_model), jnp.float32)
    pf_small = make_ffn_params(ffn_p["w1"], ffn_p["b1"], ffn_p["w2"],
                               ffn_p["b2"], compute_dtype=jnp.float32)
    ref_small = _ffn_reference(x_small, ffn_p["w1"], ffn_p["b1"],
                               ffn_p["w2"], ffn_p["b2"])
    out_small = jax.block_until_ready(ffn_pallas(x_small, pf_small))
    assert out_small.shape == ref_small.shape
    assert jnp.allclose(out_small, ref_small, atol=2e-2, rtol=2e-2), \
        "FFN (plain, f32) mismatch"

    # --- 2) Fused FFN + residual + LayerNorm at a realistic tile size -------
    Dm, Df, R = 256, 1024, 384
    k1, k2, kg, kb, kxm = jax.random.split(k_m, 5)
    w1_m, b1_m = _init_linear(k1, Dm, Df)
    w2_m, b2_m = _init_linear(k2, Df, Dm)
    gamma_m = 1.0 + 0.1 * jax.random.normal(kg, (Dm,), jnp.float32)
    beta_m = 0.1 * jax.random.normal(kb, (Dm,), jnp.float32)
    x_m = jax.random.normal(kxm, (2, R // 2, Dm), jnp.float32)

    def fused_ref(x):
        ff = _ffn_reference(x, w1_m, b1_m, w2_m, b2_m)
        return _layer_norm(x + ff, gamma_m, beta_m)

    ref_m = fused_ref(x_m)

    pf_f32 = make_ffn_params(w1_m, b1_m, w2_m, b2_m, gamma_m, beta_m,
                             compute_dtype=jnp.float32)
    out_f32 = jax.block_until_ready(
        ffn_pallas(x_m, pf_f32, fuse_residual_ln=True))
    assert jnp.allclose(out_f32, ref_m, atol=3e-2, rtol=3e-2), \
        "fused FFN+LN (f32, collapsed-k) mismatch"

    pf_bf16 = make_ffn_params(w1_m, b1_m, w2_m, b2_m, gamma_m, beta_m,
                              compute_dtype=jnp.bfloat16)
    out_bf16 = jax.block_until_ready(
        ffn_pallas(x_m, pf_bf16, fuse_residual_ln=True))
    assert jnp.allclose(out_bf16, ref_m, atol=1e-1, rtol=1e-1), \
        "fused FFN+LN (bf16) mismatch"

    # Forced d_ff tiling exercises the accumulator (reduction-axis) path.
    out_tiled = jax.block_until_ready(
        ffn_pallas(x_m, pf_f32, fuse_residual_ln=True,
                   row_tile=128, ff_tile=256))
    assert jnp.allclose(out_tiled, ref_m, atol=3e-2, rtol=3e-2), \
        "fused FFN+LN (tiled d_ff) mismatch"

    # --- 3) Full Transformer forward: Pallas FFN vs pure-JAX reference ------
    pparams = prepare_transformer_params(params, compute_dtype=jnp.float32)

    logits_ref = transformer_forward(params, src, trg, num_heads=num_heads,
                                     use_pallas_ffn=False)
    logits_ref = jax.block_until_ready(logits_ref)

    # Default path: toy shapes fall below the MAC cutoff -> fused XLA FFN.
    logits_auto = transformer_forward(pparams, src, trg, num_heads=num_heads,
                                      use_pallas_ffn=True)
    logits_auto = jax.block_until_ready(logits_auto)

    # Forced Pallas path: exercises the fused kernel end-to-end.
    logits_pallas = transformer_forward(pparams, src, trg,
                                        num_heads=num_heads,
                                        use_pallas_ffn=True,
                                        force_pallas_ffn=True)
    logits_pallas = jax.block_until_ready(logits_pallas)

    assert logits_pallas.shape == (batch, trg_len, trg_vocab)
    assert bool(jnp.all(jnp.isfinite(logits_pallas)))
    assert jnp.allclose(logits_auto, logits_ref, atol=1e-5, rtol=1e-5), \
        "Transformer (auto-fallback) mismatch"
    assert jnp.allclose(logits_pallas, logits_ref, atol=5e-2, rtol=5e-2), \
        "Transformer (Pallas FFN) mismatch"

    print("KERNEL_OK")
</pallas_src>

<mosaic_0001>
module attributes {stable_mosaic.version = 11 : i64} {
  func.func @_ffn_single_kernel(%arg0: i32, %arg1: memref<24x128xf32, #tpu.memory_space<vmem>>, %arg2: memref<128x128xf32, #tpu.memory_space<vmem>>, %arg3: memref<1x128xf32, #tpu.memory_space<vmem>>, %arg4: memref<128x128xf32, #tpu.memory_space<vmem>>, %arg5: memref<1x128xf32, #tpu.memory_space<vmem>>, %arg6: memref<1x128xf32, #tpu.memory_space<vmem>>, %arg7: memref<1x128xf32, #tpu.memory_space<vmem>>, %arg8: memref<24x128xf32, #tpu.memory_space<vmem>>) attributes {dimension_semantics = [#tpu.dimension_semantics<parallel>], iteration_bounds = array<i64: 1>, scalar_prefetch = 0 : i64, scratch_operands = 0 : i64, tpu.core_type = #tpu.core_type<tc>, window_params = [{transform_indices = @transform_0, window_bounds = array<i64: 24, 128>}, {pipeline_mode = #tpu.pipeline_mode<synchronous>, transform_indices = @transform_1, window_bounds = array<i64: 128, 128>}, {pipeline_mode = #tpu.pipeline_mode<synchronous>, transform_indices = @transform_2, window_bounds = array<i64: 1, 128>}, {pipeline_mode = #tpu.pipeline_mode<synchronous>, transform_indices = @transform_3, window_bounds = array<i64: 128, 128>}, {pipeline_mode = #tpu.pipeline_mode<synchronous>, transform_indices = @transform_4, window_bounds = array<i64: 1, 128>}, {pipeline_mode = #tpu.pipeline_mode<synchronous>, transform_indices = @transform_5, window_bounds = array<i64: 1, 128>}, {pipeline_mode = #tpu.pipeline_mode<synchronous>, transform_indices = @transform_6, window_bounds = array<i64: 1, 128>}, {transform_indices = @transform_7, window_bounds = array<i64: 24, 128>}]} {
    %c0 = arith.constant 0 : index
    %c0_0 = arith.constant 0 : index
    %0 = vector.load %arg1[%c0, %c0_0] : memref<24x128xf32, #tpu.memory_space<vmem>>, vector<24x128xf32>
    %c0_1 = arith.constant 0 : index
    %c0_2 = arith.constant 0 : index
    %1 = vector.load %arg2[%c0_1, %c0_2] : memref<128x128xf32, #tpu.memory_space<vmem>>, vector<128x128xf32>
    %cst = arith.constant dense<0.000000e+00> : vector<24x128xf32>
    %2 = tpu.matmul %0, %1, %cst {dimension_numbers = #tpu.dot_dimension_numbers<[1], [0], [0], [1], [0, 0, 1, 1], [], []>} : vector<24x128xf32>, vector<128x128xf32>, vector<24x128xf32> -> vector<24x128xf32>
    %c0_3 = arith.constant 0 : index
    %c0_4 = arith.constant 0 : index
    %3 = vector.load %arg3[%c0_3, %c0_4] : memref<1x128xf32, #tpu.memory_space<vmem>>, vector<1x128xf32>
    %4 = vector.broadcast %3 : vector<1x128xf32> to vector<24x128xf32>
    %5 = arith.addf %2, %4 : vector<24x128xf32>
    %cst_5 = arith.constant 0.000000e+00 : f32
    %6 = vector.broadcast %cst_5 : f32 to vector<24x128xf32>
    %7 = arith.maximumf %5, %6 : vector<24x128xf32>
    %c0_6 = arith.constant 0 : index
    %c0_7 = arith.constant 0 : index
    %8 = vector.load %arg4[%c0_6, %c0_7] : memref<128x128xf32, #tpu.memory_space<vmem>>, vector<128x128xf32>
    %cst_8 = arith.constant dense<0.000000e+00> : vector<24x128xf32>
    %9 = tpu.matmul %7, %8, %cst_8 {dimension_numbers = #tpu.dot_dimension_numbers<[1], [0], [0], [1], [0, 0, 1, 1], [], []>} : vector<24x128xf32>, vector<128x128xf32>, vector<24x128xf32> -> vector<24x128xf32>
    %c0_9 = arith.constant 0 : index
    %c0_10 = arith.constant 0 : index
    %10 = vector.load %arg5[%c0_9, %c0_10] : memref<1x128xf32, #tpu.memory_space<vmem>>, vector<1x128xf32>
    %11 = vector.broadcast %10 : vector<1x128xf32> to vector<24x128xf32>
    %12 = arith.addf %9, %11 : vector<24x128xf32>
    %c0_11 = arith.constant 0 : index
    %c0_12 = arith.constant 0 : index
    %13 = vector.load %arg8[%c0_11, %c0_12] : memref<24x128xf32, #tpu.memory_space<vmem>>, vector<24x128xf32>
    tpu.vector_store %arg8[%c0_11, %c0_12], %12 {strides = array<i32>} : memref<24x128xf32, #tpu.memory_space<vmem>>, vector<24x128xf32>,
    return
  }
  func.func @transform_0(%arg0: i32) -> (i32, i32) {
    %c0_i32 = arith.constant 0 : i32
    %c0_i32_0 = arith.constant 0 : i32
    return %arg0, %c0_i32 : i32, i32
  }
  func.func @transform_1(%arg0: i32) -> (i32, i32) {
    %c0_i32 = arith.constant 0 : i32
    %c0_i32_0 = arith.constant 0 : i32
    %c0_i32_1 = arith.constant 0 : i32
    return %c0_i32, %c0_i32_0 : i32, i32
  }
  func.func @transform_2(%arg0: i32) -> (i32, i32) {
    %c0_i32 = arith.constant 0 : i32
    %c0_i32_0 = arith.constant 0 : i32
    %c0_i32_1 = arith.constant 0 : i32
    return %c0_i32, %c0_i32_0 : i32, i32
  }
  func.func @transform_3(%arg0: i32) -> (i32, i32) {
    %c0_i32 = arith.constant 0 : i32
    %c0_i32_0 = arith.constant 0 : i32
    %c0_i32_1 = arith.constant 0 : i32
    return %c0_i32, %c0_i32_0 : i32, i32
  }
  func.func @transform_4(%arg0: i32) -> (i32, i32) {
    %c0_i32 = arith.constant 0 : i32
    %c0_i32_0 = arith.constant 0 : i32
    %c0_i32_1 = arith.constant 0 : i32
    return %c0_i32, %c0_i32_0 : i32, i32
  }
  func.func @transform_5(%arg0: i32) -> (i32, i32) {
    %c0_i32 = arith.constant 0 : i32
    %c0_i32_0 = arith.constant 0 : i32
    %c0_i32_1 = arith.constant 0 : i32
    return %c0_i32, %c0_i32_0 : i32, i32
  }
  func.func @transform_6(%arg0: i32) -> (i32, i32) {
    %c0_i32 = arith.constant 0 : i32
    %c0_i32_0 = arith.constant 0 : i32
    %c0_i32_1 = arith.constant 0 : i32
    return %c0_i32, %c0_i32_0 : i32, i32
  }
  func.func @transform_7(%arg0: i32) -> (i32, i32) {
    %c0_i32 = arith.constant 0 : i32
    %c0_i32_0 = arith.constant 0 : i32
    return %arg0, %c0_i32 : i32, i32
  }
}

module attributes {stable_mosaic.version = 11 : i64} {
  func.func @_ffn_single_kernel(%arg0: i32, %arg1: memref<24x128xf32, #tpu.memory_space<vmem>>, %arg2: memref<128x128xf32, #tpu.memory_space<vmem>>, %arg3: memref<1x128xf32, #tpu.memory_space<vmem>>, %arg4: memref<128x128xf32, #tpu.memory_space<vmem>>, %arg5: memref<1x128xf32, #tpu.memory_space<vmem>>, %arg6: memref<1x128xf32, #tpu.memory_space<vmem>>, %arg7: memref<1x128xf32, #tpu.memory_space<vmem>>, %arg8: memref<24x128xf32, #tpu.memory_space<vmem>>) attributes {dimension_semantics = [#tpu.dimension_semantics<parallel>], iteration_bounds = array<i64: 1>, scalar_prefetch = 0 : i64, scratch_operands = 0 : i64, tpu.core_type = #tpu.core_type<tc>, window_params = [{transform_indices = @transform_0, window_bounds = array<i64: 24, 128>}, {pipeline_mode = #tpu.pipeline_mode<synchronous>, transform_indices = @transform_1, window_bounds = array<i64: 128, 128>}, {pipeline_mode = #tpu.pipeline_mode<synchronous>, transform_indices = @transform_2, window_bounds = array<i64: 1, 128>}, {pipeline_mode = #tpu.pipeline_mode<synchronous>, transform_indices = @transform_3, window_bounds = array<i64: 128, 128>}, {pipeline_mode = #tpu.pipeline_mode<synchronous>, transform_indices = @transform_4, window_bounds = array<i64: 1, 128>}, {pipeline_mode = #tpu.pipeline_mode<synchronous>, transform_indices = @transform_5, window_bounds = array<i64: 1, 128>}, {pipeline_mode = #tpu.pipeline_mode<synchronous>, transform_indices = @transform_6, window_bounds = array<i64: 1, 128>}, {transform_indices = @transform_7, window_bounds = array<i64: 24, 128>}]} {
    %c0 = arith.constant 0 : index
    %c0_0 = arith.constant 0 : index
    %0 = vector.load %arg1[%c0, %c0_0] : memref<24x128xf32, #tpu.memory_space<vmem>>, vector<24x128xf32>
    %c0_1 = arith.constant 0 : index
    %c0_2 = arith.constant 0 : index
    %1 = vector.load %arg2[%c0_1, %c0_2] : memref<128x128xf32, #tpu.memory_space<vmem>>, vector<128x128xf32>
    %cst = arith.constant dense<0.000000e+00> : vector<24x128xf32>
    %2 = tpu.matmul %0, %1, %cst {dimension_numbers = #tpu.dot_dimension_numbers<[1], [0], [0], [1], [0, 0, 1, 1], [], []>} : vector<24x128xf32>, vector<128x128xf32>, vector<24x128xf32> -> vector<24x128xf32>
    %c0_3 = arith.constant 0 : index
    %c0_4 = arith.constant 0 : index
    %3 = vector.load %arg3[%c0_3, %c0_4] : memref<1x128xf32, #tpu.memory_space<vmem>>, vector<1x128xf32>
    %4 = vector.broadcast %3 : vector<1x128xf32> to vector<24x128xf32>
    %5 = arith.addf %2, %4 : vector<24x128xf32>
    %cst_5 = arith.constant 0.000000e+00 : f32
    %6 = vector.broadcast %cst_5 : f32 to vector<24x128xf32>
    %7 = arith.maximumf %5, %6 : vector<24x128xf32>
    %c0_6 = arith.constant 0 : index
    %c0_7 = arith.constant 0 : index
    %8 = vector.load %arg4[%c0_6, %c0_7] : memref<128x128xf32, #tpu.memory_space<vmem>>, vector<128x128xf32>
    %cst_8 = arith.constant dense<0.000000e+00> : vector<24x128xf32>
    %9 = tpu.matmul %7, %8, %cst_8 {dimension_numbers = #tpu.dot_dimension_numbers<[1], [0], [0], [1], [0, 0, 1, 1], [], []>} : vector<24x128xf32>, vector<128x128xf32>, vector<24x128xf32> -> vector<24x128xf32>
    %c0_9 = arith.constant 0 : index
    %c0_10 = arith.constant 0 : index
    %10 = vector.load %arg5[%c0_9, %c0_10] : memref<1x128xf32, #tpu.memory_space<vmem>>, vector<1x128xf32>
    %11 = vector.broadcast %10 : vector<1x128xf32> to vector<24x128xf32>
    %12 = arith.addf %9, %11 : vector<24x128xf32>
    %c0_11 = arith.constant 0 : index
    %c0_12 = arith.constant 0 : index
    %13 = vector.load %arg8[%c0_11, %c0_12] : memref<24x128xf32, #tpu.memory_space<vmem>>, vector<24x128xf32>
    tpu.vector_store %arg8[%c0_11, %c0_12], %12 {strides = array<i32>} : memref<24x128xf32, #tpu.memory_space<vmem>>, vector<24x128xf32>,
    return
  }
  func.func @transform_0(%arg0: i32) -> (i32, i32) {
    %c0_i32 = arith.constant 0 : i32
    %c0_i32_0 = arith.constant 0 : i32
    return %arg0, %c0_i32 : i32, i32
  }
  func.func @transform_1(%arg0: i32) -> (i32, i32) {
    %c0_i32 = arith.constant 0 : i32
    %c0_i32_0 = arith.constant 0 : i32
    %c0_i32_1 = arith.constant 0 : i32
    return %c0_i32, %c0_i32_0 : i32, i32
  }
  func.func @transform_2(%arg0: i32) -> (i32, i32) {
    %c0_i32 = arith.constant 0 : i32
    %c0_i32_0 = arith.constant 0 : i32
    %c0_i32_1 = arith.constant 0 : i32
    return %c0_i32, %c0_i32_0 : i32, i32
  }
  func.func @transform_3(%arg0: i32) -> (i32, i32) {
    %c0_i32 = arith.constant 0 : i32
    %c0_i32_0 = arith.constant 0 : i32
    %c0_i32_1 = arith.constant 0 : i32
    return %c0_i32, %c0_i32_0 : i32, i32
  }
  func.func @transform_4(%arg0: i32) -> (i32, i32) {
    %c0_i32 = arith.constant 0 : i32
    %c0_i32_0 = arith.constant 0 : i32
    %c0_i32_1 = arith.constant 0 : i32
    return %c0_i32, %c0_i32_0 : i32, i32
  }
  func.func @transform_5(%arg0: i32) -> (i32, i32) {
    %c0_i32 = arith.constant 0 : i32
    %c0_i32_0 = arith.constant 0 : i32
    %c0_i32_1 = arith.constant 0 : i32
    return %c0_i32, %c0_i32_0 : i32, i32
  }
  func.func @transform_6(%arg0: i32) -> (i32, i32) {
    %c0_i32 = arith.constant 0 : i32
    %c0_i32_0 = arith.constant 0 : i32
    %c0_i32_1 = arith.constant 0 : i32
    return %c0_i32, %c0_i32_0 : i32, i32
  }
  func.func @transform_7(%arg0: i32) -> (i32, i32) {
    %c0_i32 = arith.constant 0 : i32
    %c0_i32_0 = arith.constant 0 : i32
    return %arg0, %c0_i32 : i32, i32
  }
}

</mosaic_0001>

<bundles_post_ra>
// kernel: tpu_custom_call.1
= control target key start
LH: loop header
LB: loop body
LE: loop exit
PB: predicated region body
PF: predicated region fallthrough
CT: control target
= control target key end

     0   :  { %12 = vsyncpa [#allocation3], 0  ;;  %s921_s0 = inlined_call_operand.hbm [shape: f32[24,128], index: 0, kind: input, shape index: {}]   ;;  %s922_s1 = inlined_call_operand.hbm [shape: f32[128,128], index: 1, kind: input, shape index: {}]   ;;  %s923_s2 = inlined_call_operand.hbm [shape: f32[1,128], index: 2, kind: input, shape index: {}]   ;;  %s924_s3 = inlined_call_operand.hbm [shape: f32[128,128], index: 3, kind: input, shape index: {}]   ;;  %s925_s4 = inlined_call_operand.hbm [shape: f32[1,128], index: 4, kind: input, shape index: {}]   ;;  %s926_s5 = inlined_call_operand.hbm [shape: f32[1,128], index: 5, kind: input, shape index: {}]   ;;  %s927_s6 = inlined_call_operand.hbm [shape: f32[1,128], index: 6, kind: input, shape index: {}]   ;;  %s928_s7 = inlined_call_operand.hbm [shape: f32[24,128], index: 7, kind: output, shape index: {}]  }
   0x1   :  { %13 = vsyncpa [#allocation6], 0 }
   0x2   :  { %14 = vsyncpa [#allocation9], 0 }
   0x3   :  { %15 = vsyncpa [#allocation12], 0 }
   0x4   :  { %16 = vsyncpa [#allocation4], 0  ;;  %s718_s24 = smov [#allocation5]   ;;  %s719_s26 = smov [#allocation8]  }
   0x5   :  { %s34_s25 = sshll.u32 %s718_s24, 4  ;;  %s56_s27 = sshll.u32 %s719_s26, 4  ;;  %s35_s25 = int_to_ptr.vmem [resolvable:$true] %s34_s25  ;;  %s771_s27 = int_to_ptr.vmem [resolvable:$true] %s56_s27 }
   0x6   :  { %s532_s30 = scalar_lea.hbm %s922_s1, 2048 }
   0x7   :  { %p533_p0 = scmp.ne.s32.totalorder %s922_s1, %s532_s30  ;;  %p536_p1 = scmp.lt.u32.totalorder %s532_s30, %s922_s1 }
   0x9   :  { %p538_p2 = pnand %p536_p1, %p533_p0 }
   0xb   :  { %541 = shalt.err (!%p538_p2)
}
   0xc   :  { %s542_s12 = scalar_lea.vmem %s35_s25, 2048  ;;  %p547_p4 = scmp.lt.s32.totalorder %s35_s25, %s35_s25 }
   0xd   :  { %p543_p3 = scmp.ne.s32.totalorder %s35_s25, %s542_s12  ;;  %p548_p5 = scmp.lt.s32.totalorder %s542_s12, %s542_s12 }
   0xf   :  { %p549_p6 = por %p548_p5, %p547_p4 }
  0x11   :  { %p550_p7 = pnand %p549_p6, %p543_p3 }
  0x13   :  { %553 = shalt.err (!%p550_p7)
}
  0x14   :  { %s720_s13 = smov 128   ;;  %s721_s14 = smov 8  }
  0x15   :  { %40 = dma.hbm_to_vmem [thread:$0]  %s922_s1, 2048, %s35_s25, [#allocation6], %s720_s13, %s720_s13, %s721_s14  }
  0x16   :  { %s554_s19 = scalar_lea.hbm %s924_s3, 2048 }
  0x17   :  { %p555_p8 = scmp.ne.s32.totalorder %s924_s3, %s554_s19  ;;  %p558_p9 = scmp.lt.u32.totalorder %s554_s19, %s924_s3 }
  0x19   :  { %p560_p10 = pnand %p558_p9, %p555_p8 }
  0x1b   :  { %563 = shalt.err (!%p560_p10)
}
  0x1c   :  { %s564_s24 = scalar_lea.vmem %s771_s27, 2048  ;;  %p569_p12 = scmp.lt.s32.totalorder %s771_s27, %s771_s27 }
  0x1d   :  { %p565_p11 = scmp.ne.s32.totalorder %s771_s27, %s564_s24  ;;  %p570_p13 = scmp.lt.s32.totalorder %s564_s24, %s564_s24 }
  0x1f   :  { %p571_p0 = por %p570_p13, %p569_p12 }
  0x21   :  { %p572_p1 = pnand %p571_p0, %p565_p11 }
  0x23   :  { %575 = shalt.err (!%p572_p1)
}
  0x24   :  { %62 = dma.hbm_to_vmem [thread:$0]  %s924_s3, 2048, %s771_s27, [#allocation9], %s720_s13, %s720_s13, %s721_s14  }
  0x25   :  { %s722_s26 = smov [#allocation11]   ;;  %s723_s29 = smov [#allocation2]  }
  0x26   :  { %s79_s28 = sshll.u32 %s722_s26, 4  ;;  %s22_s30 = sshll.u32 %s723_s29, 4  ;;  %s80_s28 = int_to_ptr.vmem [resolvable:$true] %s79_s28  ;;  %s808_s30 = int_to_ptr.vmem [resolvable:$true] %s22_s30 }
  0x27   :  { %s576_s10 = scalar_lea.hbm %s926_s5, 16 }
  0x28   :  { %p577_p2 = scmp.ne.s32.totalorder %s926_s5, %s576_s10  ;;  %p580_p3 = scmp.lt.u32.totalorder %s576_s10, %s926_s5 }
  0x2a   :  { %p582_p4 = pnand %p580_p3, %p577_p2 }
  0x2c   :  { %585 = shalt.err (!%p582_p4)
}
  0x2d   :  { %s586_s3 = scalar_lea.vmem %s80_s28, 16  ;;  %s590_s27 = scalar_lea.vmem %s80_s28, 32 }
  0x2e   :  { %p587_p5 = scmp.ne.s32.totalorder %s80_s28, %s586_s3  ;;  %p591_p6 = scmp.lt.s32.totalorder %s80_s28, %s80_s28 }
  0x2f   :  { %p592_p7 = scmp.lt.s32.totalorder %s590_s27, %s586_s3 }
  0x31   :  { %p593_p8 = por %p592_p7, %p591_p6 }
  0x33   :  { %p594_p9 = pnand %p593_p8, %p587_p5 }
  0x35   :  { %597 = shalt.err (!%p594_p9)
}
  0x36   :  { %82 = dma.hbm_to_vmem [thread:$0]  %s926_s5, 16, %s80_s28, [#allocation12]  }
  0x37   :  { %s598_s21 = scalar_lea.hbm %s921_s0, 384 }
  0x38   :  { %p599_p10 = scmp.ne.s32.totalorder %s921_s0, %s598_s21  ;;  %p602_p11 = scmp.lt.u32.totalorder %s598_s21, %s921_s0 }
  0x3a   :  { %p604_p12 = pnand %p602_p11, %p599_p10 }
  0x3c   :  { %607 = shalt.err (!%p604_p12)
}
  0x3d   :  { %s608_s25 = scalar_lea.vmem %s808_s30, 384  ;;  %p613_p0 = scmp.lt.s32.totalorder %s808_s30, %s808_s30 }
  0x3e   :  { %p609_p13 = scmp.ne.s32.totalorder %s808_s30, %s608_s25  ;;  %p614_p1 = scmp.lt.s32.totalorder %s608_s25, %s608_s25 }
  0x40   :  { %p615_p2 = por %p614_p1, %p613_p0 }
  0x42   :  { %p616_p3 = pnand %p615_p2, %p609_p13 }
  0x44   :  { %619 = shalt.err (!%p616_p3)
}
  0x45   :  { %28 = dma.hbm_to_vmem [thread:$0]  %s921_s0, 384, %s808_s30, [#allocation3], %s720_s13, %s720_s13, %s721_s14  }
  0x46   :  { %s724_s28 = smov [#allocation7]   ;;  %s725_s8 = smov [#allocation10]  }
  0x47   :  { %s47_s29 = sshll.u32 %s724_s28, 4  ;;  %s69_s9 = sshll.u32 %s725_s8, 4  ;;  %s48_s29 = int_to_ptr.vmem [resolvable:$true] %s47_s29  ;;  %s70_s9 = int_to_ptr.vmem [resolvable:$true] %s69_s9 }
  0x48   :  { %s620_s12 = scalar_lea.hbm %s923_s2, 16 }
  0x49   :  { %p621_p4 = scmp.ne.s32.totalorder %s923_s2, %s620_s12  ;;  %p624_p5 = scmp.lt.u32.totalorder %s620_s12, %s923_s2 }
  0x4b   :  { %p626_p6 = pnand %p624_p5, %p621_p4 }
  0x4d   :  { %629 = shalt.err (!%p626_p6)
}
  0x4e   :  { %s630_s0 = scalar_lea.vmem %s48_s29, 16  ;;  %s634_s30 = scalar_lea.vmem %s48_s29, 32 }
  0x4f   :  { %p631_p7 = scmp.ne.s32.totalorder %s48_s29, %s630_s0  ;;  %p635_p8 = scmp.lt.s32.totalorder %s48_s29, %s48_s29 }
  0x50   :  { %p636_p9 = scmp.lt.s32.totalorder %s634_s30, %s630_s0 }
  0x52   :  { %p637_p10 = por %p636_p9, %p635_p8 }
  0x54   :  { %p638_p11 = pnand %p637_p10, %p631_p7 }
  0x56   :  { %641 = shalt.err (!%p638_p11)
}
  0x57   :  { %50 = dma.hbm_to_vmem [thread:$0]  %s923_s2, 16, %s48_s29, [#allocation6]  }
  0x58   :  { %s642_s21 = scalar_lea.hbm %s925_s4, 16 }
  0x59   :  { %p643_p12 = scmp.ne.s32.totalorder %s925_s4, %s642_s21  ;;  %p646_p13 = scmp.lt.u32.totalorder %s642_s21, %s925_s4 }
  0x5b   :  { %p648_p0 = pnand %p646_p13, %p643_p12 }
  0x5d   :  { %651 = shalt.err (!%p648_p0)
}
  0x5e   :  { %s652_s25 = scalar_lea.vmem %s70_s9, 16  ;;  %s656_s5 = scalar_lea.vmem %s70_s9, 32 }
  0x5f   :  { %p653_p1 = scmp.ne.s32.totalorder %s70_s9, %s652_s25  ;;  %p657_p2 = scmp.lt.s32.totalorder %s70_s9, %s70_s9 }
  0x60   :  { %p658_p3 = scmp.lt.s32.totalorder %s656_s5, %s652_s25 }
  0x62   :  { %p659_p4 = por %p658_p3, %p657_p2 }
  0x64   :  { %p660_p5 = pnand %p659_p4, %p653_p1 }
  0x66   :  { %663 = shalt.err (!%p660_p5)
}
  0x67   :  { %72 = dma.hbm_to_vmem [thread:$0]  %s925_s4, 16, %s70_s9, [#allocation9]  }
  0x68   :  { %s726_s28 = smov [#allocation13]   ;;  %s664_s11 = scalar_lea.hbm %s927_s6, 16 }
  0x69   :  { %s89_s29 = sshll.u32 %s726_s28, 4  ;;  %p665_p6 = scmp.ne.s32.totalorder %s927_s6, %s664_s11  ;;  %s90_s29 = int_to_ptr.vmem [resolvable:$true] %s89_s29 }
  0x6a   :  { %p668_p7 = scmp.lt.u32.totalorder %s664_s11, %s927_s6 }
  0x6c   :  { %p670_p8 = pnand %p668_p7, %p665_p6 }
  0x6e   :  { %673 = shalt.err (!%p670_p8)
}
  0x6f   :  { %s674_s27 = scalar_lea.vmem %s90_s29, 16  ;;  %s678_s4 = scalar_lea.vmem %s90_s29, 32 }
  0x70   :  { %p675_p9 = scmp.ne.s32.totalorder %s90_s29, %s674_s27  ;;  %p679_p10 = scmp.lt.s32.totalorder %s90_s29, %s90_s29 }
  0x71   :  { %p680_p11 = scmp.lt.s32.totalorder %s678_s4, %s674_s27 }
  0x73   :  { %p681_p12 = por %p680_p11, %p679_p10 }
  0x75   :  { %p682_p13 = pnand %p681_p12, %p675_p9 }
  0x77   :  { %685 = shalt.err (!%p682_p13)
}
  0x78   :  { %92 = dma.hbm_to_vmem [thread:$0]  %s927_s6, 16, %s90_s29, [#allocation12]  }
  0x79   :  { %708 = dma.done.wait [#allocation3], 384  }
  0x7a   :  { %709 = vsyncadd [#allocation3], 4294966912 }
  0x7b   :  { %710 = dma.done.wait [#allocation6], 2064  }
  0x7c   :  { %711 = vsyncadd [#allocation6], 4294965232 }
  0x7d   :  { %712 = dma.done.wait [#allocation9], 2064  }
  0x7e   :  { %713 = vsyncadd [#allocation9], 4294965232 }
  0x7f   :  { %714 = dma.done.wait [#allocation12], 32  }
  0x80   :  { %715 = vsyncadd [#allocation12], 4294967264  ;;  %v727_v0 = vmov 0.0|0.0   ;;  %vm728_vm0 = vmmov 0   ;;  %v729_v1 = vmov 0.0   ;;  %v117_v2 = vld [vmem:[#allocation5] sm:$0xff] }
  0x81   :  { %471 = vmatprep.subr.bf16.mxu0 %v727_v0  ;;  %421 = vmatprep.mubr.msk.f32.mxu0 %vm728_vm0, %v729_v1  ;;  %v118_v3 = vld [vmem:[#allocation5 + $0x8] sm:$0xff]  ;;  %v119_v4 = vld [vmem:[#allocation5 + $0x10] sm:$0xff]  ;;  %v120_v6 = vld [vmem:[#allocation5 + $0x18] sm:$0xff]  ;;  %s730_s6 = smov [#allocation14]  }
  0x82   :  { %495 = vmatprep.subr.bf16.mxu1 %v727_v0  ;;  %462 = vmatprep.mubr.msk.f32.mxu1 %vm728_vm0, %v729_v1  ;;  %v472_v5 = vpack.c.bf16 %v118_v3, %v117_v2  ;;  %v475_v7 = vpack.c.bf16 %v120_v6, %v119_v4  ;;  %v121_v8 = vld [vmem:[#allocation5 + $0x20] sm:$0xff]  ;;  %v122_v9 = vld [vmem:[#allocation5 + $0x28] sm:$0xff]  ;;  %v225_v14 = vld [vmem:[#allocation8 + $0x10] sm:$0xff]  ;;  %s334_s30 = sshll.u32 %s730_s6, 4  ;;  %s335_s30 = int_to_ptr.vmem [resolvable:$true] %s334_s30 }
  0x83   :  { %v223_v10 = vld [vmem:[#allocation8] sm:$0xff]  ;;  %v224_v11 = vld [vmem:[#allocation8 + $0x8] sm:$0xff]  ;;  %v478_v12 = vpack.c.bf16 %v122_v9, %v121_v8  ;;  %v226_v15 = vld [vmem:[#allocation8 + $0x18] sm:$0xff]  ;;  %s686_s17 = scalar_lea.vmem %s335_s30, 384  ;;  %p691_p1 = scmp.lt.s32.totalorder %s335_s30, %s335_s30 }
  0x84   :  { %473 = vmatpush3.bf16.msra.mxu0 %v472_v5  ;;  %v496_v13 = vpack.c.bf16 %v224_v11, %v223_v10  ;;  %v123_v16 = vld [vmem:[#allocation5 + $0x30] sm:$0xff]  ;;  %v124_v17 = vld [vmem:[#allocation5 + $0x38] sm:$0xff]  ;;  %v499_v18 = vpack.c.bf16 %v226_v15, %v225_v14  ;;  %v227_v19 = vld [vmem:[#allocation8 + $0x20] sm:$0xff]  ;;  %p687_p0 = scmp.ne.s32.totalorder %s335_s30, %s686_s17  ;;  %p692_p2 = scmp.lt.s32.totalorder %s686_s17, %s686_s17 }
  0x85   :  { %474 = vmatprep.subr.bf16.mxu0 %v727_v0  ;;  %v228_v20 = vld [vmem:[#allocation8 + $0x28] sm:$0xff]  ;;  %v481_v21 = vpack.c.bf16 %v124_v17, %v123_v16  ;;  %v125_v22 = vld [vmem:[#allocation5 + $0x40] sm:$0xff]  ;;  %v229_v25 = vld [vmem:[#allocation8 + $0x30] sm:$0xff] }
  0x86   :  { %497 = vmatpush3.bf16.msra.mxu1 %v496_v13  ;;  %v126_v23 = vld [vmem:[#allocation5 + $0x48] sm:$0xff]  ;;  %v502_v24 = vpack.c.bf16 %v228_v20, %v227_v19  ;;  %v230_v26 = vld [vmem:[#allocation8 + $0x38] sm:$0xff]  ;;  %v127_v28 = vld [vmem:[#allocation5 + $0x50] sm:$0xff]  ;;  %p693_p3 = por %p692_p2, %p691_p1 }
  0x87   :  { %498 = vmatprep.subr.bf16.mxu1 %v727_v0  ;;  %v484_v27 = vpack.c.bf16 %v126_v23, %v125_v22  ;;  %v128_v29 = vld [vmem:[#allocation5 + $0x58] sm:$0xff]  ;;  %v505_v30 = vpack.c.bf16 %v230_v26, %v229_v25  ;;  %v231_v31 = vld [vmem:[#allocation8 + $0x40] sm:$0xff]  ;;  %v232_v32 = vld [vmem:[#allocation8 + $0x48] sm:$0xff] }
  0x88   :  { %476 = vmatpush3.bf16.msra.mxu0 %v475_v7  ;;  %v487_v33 = vpack.c.bf16 %v128_v29, %v127_v28  ;;  %v129_v34 = vld [vmem:[#allocation5 + $0x60] sm:$0xff]  ;;  %v130_v35 = vld [vmem:[#allocation5 + $0x68] sm:$0xff]  ;;  %v508_v36 = vpack.c.bf16 %v232_v32, %v231_v31  ;;  %v233_v37 = vld [vmem:[#allocation8 + $0x50] sm:$0xff]  ;;  %p694_p4 = pnand %p693_p3, %p687_p0 }
  0x89   :  { %477 = vmatprep.subr.bf16.mxu0 %v727_v0  ;;  %v234_v38 = vld [vmem:[#allocation8 + $0x58] sm:$0xff]  ;;  %v490_v39 = vpack.c.bf16 %v130_v35, %v129_v34  ;;  %v131_v40 = vld [vmem:[#allocation5 + $0x70] sm:$0xff]  ;;  %v235_v43 = vld [vmem:[#allocation8 + $0x60] sm:$0xff] }
  0x8a   :  { %500 = vmatpush3.bf16.msra.mxu1 %v499_v18  ;;  %v132_v41 = vld [vmem:[#allocation5 + $0x78] sm:$0xff]  ;;  %v511_v42 = vpack.c.bf16 %v234_v38, %v233_v37  ;;  %v236_v44 = vld [vmem:[#allocation8 + $0x68] sm:$0xff]  ;;  %v349_v53 = vld [vmem:[#allocation7] ss:$0 sm:$0xff] }
  0x8b   :  { %501 = vmatprep.subr.bf16.mxu1 %v727_v0  ;;  %v493_v45 = vpack.c.bf16 %v132_v41, %v131_v40  ;;  %v514_v46 = vpack.c.bf16 %v236_v44, %v235_v43  ;;  %v114_v47 = vld [vmem:[#allocation2] sm:$0xff]  ;;  %v115_v48 = vld [vmem:[#allocation2 + $0x8] sm:$0xff]  ;;  %v116_v49 = vld [vmem:[#allocation2 + $0x10] sm:$0xff] }
  0x8c   :  { %479 = vmatpush3.bf16.msra.mxu0 %v478_v12  ;;  %v237_v50 = vld [vmem:[#allocation8 + $0x70] sm:$0xff]  ;;  %v238_v51 = vld [vmem:[#allocation8 + $0x78] sm:$0xff]  ;;  %v350_v3 = vld [vmem:[#allocation10] ss:$0 sm:$0xff] }
  0x8d   :  { %480 = vmatprep.subr.bf16.mxu0 %v727_v0  ;;  %v517_v52 = vpack.c.bf16 %v238_v51, %v237_v50 }
  0x8e   :  { %503 = vmatpush3.bf16.msra.mxu1 %v502_v24 }
  0x8f   :  { %504 = vmatprep.subr.bf16.mxu1 %v727_v0 }
  0x90   :  { %482 = vmatpush3.bf16.msra.mxu0 %v481_v21 }
  0x91   :  { %483 = vmatprep.subr.bf16.mxu0 %v727_v0 }
  0x92   :  { %506 = vmatpush3.bf16.msra.mxu1 %v505_v30 }
  0x93   :  { %507 = vmatprep.subr.bf16.mxu1 %v727_v0 }
  0x94   :  { %485 = vmatpush3.bf16.msra.mxu0 %v484_v27 }
  0x95   :  { %486 = vmatprep.subr.bf16.mxu0 %v727_v0 }
  0x96   :  { %509 = vmatpush3.bf16.msra.mxu1 %v508_v36 }
  0x97   :  { %510 = vmatprep.subr.bf16.mxu1 %v727_v0 }
  0x98   :  { %488 = vmatpush3.bf16.msra.mxu0 %v487_v33 }
  0x99   :  { %489 = vmatprep.subr.bf16.mxu0 %v727_v0 }
  0x9a   :  { %512 = vmatpush3.bf16.msra.mxu1 %v511_v42 }
  0x9b   :  { %513 = vmatprep.subr.bf16.mxu1 %v727_v0 }
  0x9c   :  { %491 = vmatpush3.bf16.msra.mxu0 %v490_v39 }
  0x9d   :  { %492 = vmatprep.subr.bf16.mxu0 %v727_v0 }
  0x9e   :  { %515 = vmatpush3.bf16.msra.mxu1 %v514_v46 }
  0x9f   :  { %516 = vmatprep.subr.bf16.mxu1 %v727_v0 }
  0xa0   :  { %494 = vmatpush3.bf16.msra.mxu0 %v493_v45 }
  0xa2   :  { %518 = vmatpush3.bf16.msra.mxu1 %v517_v52 }
  0xa3   :  { %422 = vmatmul.mubr.f32.vlgmr.msra.gmra.mrb[0].mxu0 %v114_v47 }
  0xa4   :  { %424 = vmatprep.mubr.msk.f32.mxu0 %vm728_vm0, %v729_v1 }
  0xa7   :  { %425 = vmatmul.mubr.f32.gmra.mrb[2].mxu0 %v115_v48 }
  0xa8   :  { %427 = vmatprep.mubr.msk.f32.mxu0 %vm728_vm0, %v729_v1 }
  0xab   :  { %428 = vmatmul.mubr.f32.gmra.mrb[4].mxu0 %v116_v49 }
 0x176   :  { %v206_v54 = vpop.f32.mrb[0].mxu0 }
 0x177   :  { %v207_v55 = vadd.f32 %v349_v53, %v206_v54  ;;  %v423_v56 = vpop.f32.mrb[1].mxu0 }
 0x179   :  { %v220_v57 = vmax.f32 %v207_v55, 0.0 }
 0x17a   :  { %v211_v58 = vpop.f32.mrb[2].mxu0 }
 0x17b   :  { %v212_v59 = vadd.f32 %v349_v53, %v211_v58  ;;  %v426_v60 = vpop.f32.mrb[3].mxu0  ;;  %463 = vmatmul.mubr.f32.vlgmr.msra.gmra.mrb[0].mxu1 %v220_v57 }
 0x17c   :  { %465 = vmatprep.mubr.msk.f32.mxu1 %vm728_vm0, %v729_v1 }
 0x17d   :  { %v221_v61 = vmax.f32 %v212_v59, 0.0 }
 0x17e   :  { %v216_v62 = vpop.f32.mrb[4].mxu0 }
 0x17f   :  { %v217_v63 = vadd.f32 %v349_v53, %v216_v62  ;;  %v429_v0 = vpop.f32.mrb[5].mxu0  ;;  %466 = vmatmul.mubr.f32.gmra.mrb[2].mxu1 %v221_v61 }
 0x180   :  { %468 = vmatprep.mubr.msk.f32.mxu1 %vm728_vm0, %v729_v1 }
 0x181   :  { %v222_v2 = vmax.f32 %v217_v63, 0.0 }
 0x183   :  { %469 = vmatmul.mubr.f32.gmra.mrb[4].mxu1 %v222_v2 }
 0x24e   :  { %v312_v4 = vpop.f32.mrb[0].mxu1 }
 0x24f   :  { %v313_v5 = vadd.f32 %v350_v3, %v312_v4  ;;  %v464_v6 = vpop.f32.mrb[1].mxu1 }
 0x251   :  { %326 = vst [vmem:[#allocation14] sm:$0xff] %v313_v5 }
 0x252   :  { %v317_v7 = vpop.f32.mrb[2].mxu1 }
 0x253   :  { %v318_v8 = vadd.f32 %v350_v3, %v317_v7  ;;  %v467_v9 = vpop.f32.mrb[3].mxu1 }
 0x255   :  { %327 = vst [vmem:[#allocation14 + $0x8] sm:$0xff] %v318_v8 }
 0x256   :  { %v322_v10 = vpop.f32.mrb[4].mxu1 }
 0x257   :  { %v323_v11 = vadd.f32 %v350_v3, %v322_v10  ;;  %v470_v12 = vpop.f32.mrb[5].mxu1 }
 0x259   :  { %328 = vst [vmem:[#allocation14 + $0x10] sm:$0xff] %v323_v11 }
 0x25a   :  { %697 = shalt.err (!%p694_p4)
}
 0x25b   :  { %s698_s20 = scalar_lea.hbm %s928_s7, 384 }
 0x25c   :  { %p699_p5 = scmp.ne.s32.totalorder %s928_s7, %s698_s20  ;;  %p702_p6 = scmp.lt.u32.totalorder %s698_s20, %s928_s7 }
 0x25e   :  { %p704_p7 = pnand %p702_p6, %p699_p5 }
 0x260   :  { %707 = shalt.err (!%p704_p7)
}
 0x261   :  { %340 = dma.vmem_to_hbm [thread:$0]  %s335_s30, 384, %s928_s7, [#allocation4], %s720_s13, %s720_s13, %s721_s14  }
 0x262   :  { %716 = dma.done.wait [#allocation4], 384  }
 0x263   :  { %717 = vsyncadd [#allocation4], 4294966912 }
 0x264   :  { %344 = vsyncpa [#allocation3], 1 }
 0x265   :  { %345 = vsyncpa [#allocation6], 1 }
 0x266   :  { %346 = vsyncpa [#allocation9], 1 }
 0x267   :  { %347 = vsyncpa [#allocation12], 1 }
 0x268   :  { %348 = vsyncpa [#allocation4], 1 }

// kernel: tpu_custom_call.1
= control target key start
LH: loop header
LB: loop body
LE: loop exit
PB: predicated region body
PF: predicated region fallthrough
CT: control target
= control target key end

     0   :  { %12 = vsyncpa [#allocation3], 0  ;;  %s921_s0 = inlined_call_operand.hbm [shape: f32[24,128], index: 0, kind: input, shape index: {}]   ;;  %s922_s1 = inlined_call_operand.hbm [shape: f32[128,128], index: 1, kind: input, shape index: {}]   ;;  %s923_s2 = inlined_call_operand.hbm [shape: f32[1,128], index: 2, kind: input, shape index: {}]   ;;  %s924_s3 = inlined_call_operand.hbm [shape: f32[128,128], index: 3, kind: input, shape index: {}]   ;;  %s925_s4 = inlined_call_operand.hbm [shape: f32[1,128], index: 4, kind: input, shape index: {}]   ;;  %s926_s5 = inlined_call_operand.hbm [shape: f32[1,128], index: 5, kind: input, shape index: {}]   ;;  %s927_s6 = inlined_call_operand.hbm [shape: f32[1,128], index: 6, kind: input, shape index: {}]   ;;  %s928_s7 = inlined_call_operand.hbm [shape: f32[24,128], index: 7, kind: output, shape index: {}]  }
   0x1   :  { %13 = vsyncpa [#allocation6], 0 }
   0x2   :  { %14 = vsyncpa [#allocation9], 0 }
   0x3   :  { %15 = vsyncpa [#allocation12], 0 }
   0x4   :  { %16 = vsyncpa [#allocation4], 0  ;;  %s718_s24 = smov [#allocation5]   ;;  %s719_s26 = smov [#allocation8]  }
   0x5   :  { %s34_s25 = sshll.u32 %s718_s24, 4  ;;  %s56_s27 = sshll.u32 %s719_s26, 4  ;;  %s35_s25 = int_to_ptr.vmem [resolvable:$true] %s34_s25  ;;  %s771_s27 = int_to_ptr.vmem [resolvable:$true] %s56_s27 }
   0x6   :  { %s532_s30 = scalar_lea.hbm %s922_s1, 2048 }
   0x7   :  { %p533_p0 = scmp.ne.s32.totalorder %s922_s1, %s532_s30  ;;  %p536_p1 = scmp.lt.u32.totalorder %s532_s30, %s922_s1 }
   0x9   :  { %p538_p2 = pnand %p536_p1, %p533_p0 }
   0xb   :  { %541 = shalt.err (!%p538_p2)
}
   0xc   :  { %s542_s12 = scalar_lea.vmem %s35_s25, 2048  ;;  %p547_p4 = scmp.lt.s32.totalorder %s35_s25, %s35_s25 }
   0xd   :  { %p543_p3 = scmp.ne.s32.totalorder %s35_s25, %s542_s12  ;;  %p548_p5 = scmp.lt.s32.totalorder %s542_s12, %s542_s12 }
   0xf   :  { %p549_p6 = por %p548_p5, %p547_p4 }
  0x11   :  { %p550_p7 = pnand %p549_p6, %p543_p3 }
  0x13   :  { %553 = shalt.err (!%p550_p7)
}
  0x14   :  { %s720_s13 = smov 128   ;;  %s721_s14 = smov 8  }
  0x15   :  { %40 = dma.hbm_to_vmem [thread:$0]  %s922_s1, 2048, %s35_s25, [#allocation6], %s720_s13, %s720_s13, %s721_s14  }
  0x16   :  { %s554_s19 = scalar_lea.hbm %s924_s3, 2048 }
  0x17   :  { %p555_p8 = scmp.ne.s32.totalorder %s924_s3, %s554_s19  ;;  %p558_p9 = scmp.lt.u32.totalorder %s554_s19, %s924_s3 }
  0x19   :  { %p560_p10 = pnand %p558_p9, %p555_p8 }
  0x1b   :  { %563 = shalt.err (!%p560_p10)
}
  0x1c   :  { %s564_s24 = scalar_lea.vmem %s771_s27, 2048  ;;  %p569_p12 = scmp.lt.s32.totalorder %s771_s27, %s771_s27 }
  0x1d   :  { %p565_p11 = scmp.ne.s32.totalorder %s771_s27, %s564_s24  ;;  %p570_p13 = scmp.lt.s32.totalorder %s564_s24, %s564_s24 }
  0x1f   :  { %p571_p0 = por %p570_p13, %p569_p12 }
  0x21   :  { %p572_p1 = pnand %p571_p0, %p565_p11 }
  0x23   :  { %575 = shalt.err (!%p572_p1)
}
  0x24   :  { %62 = dma.hbm_to_vmem [thread:$0]  %s924_s3, 2048, %s771_s27, [#allocation9], %s720_s13, %s720_s13, %s721_s14  }
  0x25   :  { %s722_s26 = smov [#allocation11]   ;;  %s723_s29 = smov [#allocation2]  }
  0x26   :  { %s79_s28 = sshll.u32 %s722_s26, 4  ;;  %s22_s30 = sshll.u32 %s723_s29, 4  ;;  %s80_s28 = int_to_ptr.vmem [resolvable:$true] %s79_s28  ;;  %s808_s30 = int_to_ptr.vmem [resolvable:$true] %s22_s30 }
  0x27   :  { %s576_s10 = scalar_lea.hbm %s926_s5, 16 }
  0x28   :  { %p577_p2 = scmp.ne.s32.totalorder %s926_s5, %s576_s10  ;;  %p580_p3 = scmp.lt.u32.totalorder %s576_s10, %s926_s5 }
  0x2a   :  { %p582_p4 = pnand %p580_p3, %p577_p2 }
  0x2c   :  { %585 = shalt.err (!%p582_p4)
}
  0x2d   :  { %s586_s3 = scalar_lea.vmem %s80_s28, 16  ;;  %s590_s27 = scalar_lea.vmem %s80_s28, 32 }
  0x2e   :  { %p587_p5 = scmp.ne.s32.totalorder %s80_s28, %s586_s3  ;;  %p591_p6 = scmp.lt.s32.totalorder %s80_s28, %s80_s28 }
  0x2f   :  { %p592_p7 = scmp.lt.s32.totalorder %s590_s27, %s586_s3 }
  0x31   :  { %p593_p8 = por %p592_p7, %p591_p6 }
  0x33   :  { %p594_p9 = pnand %p593_p8, %p587_p5 }
  0x35   :  { %597 = shalt.err (!%p594_p9)
}
  0x36   :  { %82 = dma.hbm_to_vmem [thread:$0]  %s926_s5, 16, %s80_s28, [#allocation12]  }
  0x37   :  { %s598_s21 = scalar_lea.hbm %s921_s0, 384 }
  0x38   :  { %p599_p10 = scmp.ne.s32.totalorder %s921_s0, %s598_s21  ;;  %p602_p11 = scmp.lt.u32.totalorder %s598_s21, %s921_s0 }
  0x3a   :  { %p604_p12 = pnand %p602_p11, %p599_p10 }
  0x3c   :  { %607 = shalt.err (!%p604_p12)
}
  0x3d   :  { %s608_s25 = scalar_lea.vmem %s808_s30, 384  ;;  %p613_p0 = scmp.lt.s32.totalorder %s808_s30, %s808_s30 }
  0x3e   :  { %p609_p13 = scmp.ne.s32.totalorder %s808_s30, %s608_s25  ;;  %p614_p1 = scmp.lt.s32.totalorder %s608_s25, %s608_s25 }
  0x40   :  { %p615_p2 = por %p614_p1, %p613_p0 }
  0x42   :  { %p616_p3 = pnand %p615_p2, %p609_p13 }
  0x44   :  { %619 = shalt.err (!%p616_p3)
}
  0x45   :  { %28 = dma.hbm_to_vmem [thread:$0]  %s921_s0, 384, %s808_s30, [#allocation3], %s720_s13, %s720_s13, %s721_s14  }
  0x46   :  { %s724_s28 = smov [#allocation7]   ;;  %s725_s8 = smov [#allocation10]  }
  0x47   :  { %s47_s29 = sshll.u32 %s724_s28, 4  ;;  %s69_s9 = sshll.u32 %s725_s8, 4  ;;  %s48_s29 = int_to_ptr.vmem [resolvable:$true] %s47_s29  ;;  %s70_s9 = int_to_ptr.vmem [resolvable:$true] %s69_s9 }
  0x48   :  { %s620_s12 = scalar_lea.hbm %s923_s2, 16 }
  0x49   :  { %p621_p4 = scmp.ne.s32.totalorder %s923_s2, %s620_s12  ;;  %p624_p5 = scmp.lt.u32.totalorder %s620_s12, %s923_s2 }
  0x4b   :  { %p626_p6 = pnand %p624_p5, %p621_p4 }
  0x4d   :  { %629 = shalt.err (!%p626_p6)
}
  0x4e   :  { %s630_s0 = scalar_lea.vmem %s48_s29, 16  ;;  %s634_s30 = scalar_lea.vmem %s48_s29, 32 }
  0x4f   :  { %p631_p7 = scmp.ne.s32.totalorder %s48_s29, %s630_s0  ;;  %p635_p8 = scmp.lt.s32.totalorder %s48_s29, %s48_s29 }
  0x50   :  { %p636_p9 = scmp.lt.s32.totalorder %s634_s30, %s630_s0 }
  0x52   :  { %p637_p10 = por %p636_p9, %p635_p8 }
  0x54   :  { %p638_p11 = pnand %p637_p10, %p631_p7 }
  0x56   :  { %641 = shalt.err (!%p638_p11)
}
  0x57   :  { %50 = dma.hbm_to_vmem [thread:$0]  %s923_s2, 16, %s48_s29, [#allocation6]  }
  0x58   :  { %s642_s21 = scalar_lea.hbm %s925_s4, 16 }
  0x59   :  { %p643_p12 = scmp.ne.s32.totalorder %s925_s4, %s642_s21  ;;  %p646_p13 = scmp.lt.u32.totalorder %s642_s21, %s925_s4 }
  0x5b   :  { %p648_p0 = pnand %p646_p13, %p643_p12 }
  0x5d   :  { %651 = shalt.err (!%p648_p0)
}
  0x5e   :  { %s652_s25 = scalar_lea.vmem %s70_s9, 16  ;;  %s656_s5 = scalar_lea.vmem %s70_s9, 32 }
  0x5f   :  { %p653_p1 = scmp.ne.s32.totalorder %s70_s9, %s652_s25  ;;  %p657_p2 = scmp.lt.s32.totalorder %s70_s9, %s70_s9 }
  0x60   :  { %p658_p3 = scmp.lt.s32.totalorder %s656_s5, %s652_s25 }
  0x62   :  { %p659_p4 = por %p658_p3, %p657_p2 }
  0x64   :  { %p660_p5 = pnand %p659_p4, %p653_p1 }
  0x66   :  { %663 = shalt.err (!%p660_p5)
}
  0x67   :  { %72 = dma.hbm_to_vmem [thread:$0]  %s925_s4, 16, %s70_s9, [#allocation9]  }
  0x68   :  { %s726_s28 = smov [#allocation13]   ;;  %s664_s11 = scalar_lea.hbm %s927_s6, 16 }
  0x69   :  { %s89_s29 = sshll.u32 %s726_s28, 4  ;;  %p665_p6 = scmp.ne.s32.totalorder %s927_s6, %s664_s11  ;;  %s90_s29 = int_to_ptr.vmem [resolvable:$true] %s89_s29 }
  0x6a   :  { %p668_p7 = scmp.lt.u32.totalorder %s664_s11, %s927_s6 }
  0x6c   :  { %p670_p8 = pnand %p668_p7, %p665_p6 }
  0x6e   :  { %673 = shalt.err (!%p670_p8)
}
  0x6f   :  { %s674_s27 = scalar_lea.vmem %s90_s29, 16  ;;  %s678_s4 = scalar_lea.vmem %s90_s29, 32 }
  0x70   :  { %p675_p9 = scmp.ne.s32.totalorder %s90_s29, %s674_s27  ;;  %p679_p10 = scmp.lt.s32.totalorder %s90_s29, %s90_s29 }
  0x71   :  { %p680_p11 = scmp.lt.s32.totalorder %s678_s4, %s674_s27 }
  0x73   :  { %p681_p12 = por %p680_p11, %p679_p10 }
  0x75   :  { %p682_p13 = pnand %p681_p12, %p675_p9 }
  0x77   :  { %685 = shalt.err (!%p682_p13)
}
  0x78   :  { %92 = dma.hbm_to_vmem [thread:$0]  %s927_s6, 16, %s90_s29, [#allocation12]  }
  0x79   :  { %708 = dma.done.wait [#allocation3], 384  }
  0x7a   :  { %709 = vsyncadd [#allocation3], 4294966912 }
  0x7b   :  { %710 = dma.done.wait [#allocation6], 2064  }
  0x7c   :  { %711 = vsyncadd [#allocation6], 4294965232 }
  0x7d   :  { %712 = dma.done.wait [#allocation9], 2064  }
  0x7e   :  { %713 = vsyncadd [#allocation9], 4294965232 }
  0x7f   :  { %714 = dma.done.wait [#allocation12], 32  }
  0x80   :  { %715 = vsyncadd [#allocation12], 4294967264  ;;  %v727_v0 = vmov 0.0|0.0   ;;  %vm728_vm0 = vmmov 0   ;;  %v729_v1 = vmov 0.0   ;;  %v117_v2 = vld [vmem:[#allocation5] sm:$0xff] }
  0x81   :  { %471 = vmatprep.subr.bf16.mxu0 %v727_v0  ;;  %421 = vmatprep.mubr.msk.f32.mxu0 %vm728_vm0, %v729_v1  ;;  %v118_v3 = vld [vmem:[#allocation5 + $0x8] sm:$0xff]  ;;  %v119_v4 = vld [vmem:[#allocation5 + $0x10] sm:$0xff]  ;;  %v120_v6 = vld [vmem:[#allocation5 + $0x18] sm:$0xff]  ;;  %s730_s6 = smov [#allocation14]  }
  0x82   :  { %495 = vmatprep.subr.bf16.mxu1 %v727_v0  ;;  %462 = vmatprep.mubr.msk.f32.mxu1 %vm728_vm0, %v729_v1  ;;  %v472_v5 = vpack.c.bf16 %v118_v3, %v117_v2  ;;  %v475_v7 = vpack.c.bf16 %v120_v6, %v119_v4  ;;  %v121_v8 = vld [vmem:[#allocation5 + $0x20] sm:$0xff]  ;;  %v122_v9 = vld [vmem:[#allocation5 + $0x28] sm:$0xff]  ;;  %v225_v14 = vld [vmem:[#allocation8 + $0x10] sm:$0xff]  ;;  %s334_s30 = sshll.u32 %s730_s6, 4  ;;  %s335_s30 = int_to_ptr.vmem [resolvable:$true] %s334_s30 }
  0x83   :  { %v223_v10 = vld [vmem:[#allocation8] sm:$0xff]  ;;  %v224_v11 = vld [vmem:[#allocation8 + $0x8] sm:$0xff]  ;;  %v478_v12 = vpack.c.bf16 %v122_v9, %v121_v8  ;;  %v226_v15 = vld [vmem:[#allocation8 + $0x18] sm:$0xff]  ;;  %s686_s17 = scalar_lea.vmem %s335_s30, 384  ;;  %p691_p1 = scmp.lt.s32.totalorder %s335_s30, %s335_s30 }
  0x84   :  { %473 = vmatpush3.bf16.msra.mxu0 %v472_v5  ;;  %v496_v13 = vpack.c.bf16 %v224_v11, %v223_v10  ;;  %v123_v16 = vld [vmem:[#allocation5 + $0x30] sm:$0xff]  ;;  %v124_v17 = vld [vmem:[#allocation5 + $0x38] sm:$0xff]  ;;  %v499_v18 = vpack.c.bf16 %v226_v15, %v225_v14  ;;  %v227_v19 = vld [vmem:[#allocation8 + $0x20] sm:$0xff]  ;;  %p687_p0 = scmp.ne.s32.totalorder %s335_s30, %s686_s17  ;;  %p692_p2 = scmp.lt.s32.totalorder %s686_s17, %s686_s17 }
  0x85   :  { %474 = vmatprep.subr.bf16.mxu0 %v727_v0  ;;  %v228_v20 = vld [vmem:[#allocation8 + $0x28] sm:$0xff]  ;;  %v481_v21 = vpack.c.bf16 %v124_v17, %v123_v16  ;;  %v125_v22 = vld [vmem:[#allocation5 + $0x40] sm:$0xff]  ;;  %v229_v25 = vld [vmem:[#allocation8 + $0x30] sm:$0xff] }
  0x86   :  { %497 = vmatpush3.bf16.msra.mxu1 %v496_v13  ;;  %v126_v23 = vld [vmem:[#allocation5 + $0x48] sm:$0xff]  ;;  %v502_v24 = vpack.c.bf16 %v228_v20, %v227_v19  ;;  %v230_v26 = vld [vmem:[#allocation8 + $0x38] sm:$0xff]  ;;  %v127_v28 = vld [vmem:[#allocation5 + $0x50] sm:$0xff]  ;;  %p693_p3 = por %p692_p2, %p691_p1 }
  0x87   :  { %498 = vmatprep.subr.bf16.mxu1 %v727_v0  ;;  %v484_v27 = vpack.c.bf16 %v126_v23, %v125_v22  ;;  %v128_v29 = vld [vmem:[#allocation5 + $0x58] sm:$0xff]  ;;  %v505_v30 = vpack.c.bf16 %v230_v26, %v229_v25  ;;  %v231_v31 = vld [vmem:[#allocation8 + $0x40] sm:$0xff]  ;;  %v232_v32 = vld [vmem:[#allocation8 + $0x48] sm:$0xff] }
  0x88   :  { %476 = vmatpush3.bf16.msra.mxu0 %v475_v7  ;;  %v487_v33 = vpack.c.bf16 %v128_v29, %v127_v28  ;;  %v129_v34 = vld [vmem:[#allocation5 + $0x60] sm:$0xff]  ;;  %v130_v35 = vld [vmem:[#allocation5 + $0x68] sm:$0xff]  ;;  %v508_v36 = vpack.c.bf16 %v232_v32, %v231_v31  ;;  %v233_v37 = vld [vmem:[#allocation8 + $0x50] sm:$0xff]  ;;  %p694_p4 = pnand %p693_p3, %p687_p0 }
  0x89   :  { %477 = vmatprep.subr.bf16.mxu0 %v727_v0  ;;  %v234_v38 = vld [vmem:[#allocation8 + $0x58] sm:$0xff]  ;;  %v490_v39 = vpack.c.bf16 %v130_v35, %v129_v34  ;;  %v131_v40 = vld [vmem:[#allocation5 + $0x70] sm:$0xff]  ;;  %v235_v43 = vld [vmem:[#allocation8 + $0x60] sm:$0xff] }
  0x8a   :  { %500 = vmatpush3.bf16.msra.mxu1 %v499_v18  ;;  %v132_v41 = vld [vmem:[#allocation5 + $0x78] sm:$0xff]  ;;  %v511_v42 = vpack.c.bf16 %v234_v38, %v233_v37  ;;  %v236_v44 = vld [vmem:[#allocation8 + $0x68] sm:$0xff]  ;;  %v349_v53 = vld [vmem:[#allocation7] ss:$0 sm:$0xff] }
  0x8b   :  { %501 = vmatprep.subr.bf16.mxu1 %v727_v0  ;;  %v493_v45 = vpack.c.bf16 %v132_v41, %v131_v40  ;;  %v514_v46 = vpack.c.bf16 %v236_v44, %v235_v43  ;;  %v114_v47 = vld [vmem:[#allocation2] sm:$0xff]  ;;  %v115_v48 = vld [vmem:[#allocation2 + $0x8] sm:$0xff]  ;;  %v116_v49 = vld [vmem:[#allocation2 + $0x10] sm:$0xff] }
  0x8c   :  { %479 = vmatpush3.bf16.msra.mxu0 %v478_v12  ;;  %v237_v50 = vld [vmem:[#allocation8 + $0x70] sm:$0xff]  ;;  %v238_v51 = vld [vmem:[#allocation8 + $0x78] sm:$0xff]  ;;  %v350_v3 = vld [vmem:[#allocation10] ss:$0 sm:$0xff] }
  0x8d   :  { %480 = vmatprep.subr.bf16.mxu0 %v727_v0  ;;  %v517_v52 = vpack.c.bf16 %v238_v51, %v237_v50 }
  0x8e   :  { %503 = vmatpush3.bf16.msra.mxu1 %v502_v24 }
  0x8f   :  { %504 = vmatprep.subr.bf16.mxu1 %v727_v0 }
  0x90   :  { %482 = vmatpush3.bf16.msra.mxu0 %v481_v21 }
  0x91   :  { %483 = vmatprep.subr.bf16.mxu0 %v727_v0 }
  0x92   :  { %506 = vmatpush3.bf16.msra.mxu1 %v505_v30 }
  0x93   :  { %507 = vmatprep.subr.bf16.mxu1 %v727_v0 }
  0x94   :  { %485 = vmatpush3.bf16.msra.mxu0 %v484_v27 }
  0x95   :  { %486 = vmatprep.subr.bf16.mxu0 %v727_v0 }
  0x96   :  { %509 = vmatpush3.bf16.msra.mxu1 %v508_v36 }
  0x97   :  { %510 = vmatprep.subr.bf16.mxu1 %v727_v0 }
  0x98   :  { %488 = vmatpush3.bf16.msra.mxu0 %v487_v33 }
  0x99   :  { %489 = vmatprep.subr.bf16.mxu0 %v727_v0 }
  0x9a   :  { %512 = vmatpush3.bf16.msra.mxu1 %v511_v42 }
  0x9b   :  { %513 = vmatprep.subr.bf16.mxu1 %v727_v0 }
  0x9c   :  { %491 = vmatpush3.bf16.msra.mxu0 %v490_v39 }
  0x9d   :  { %492 = vmatprep.subr.bf16.mxu0 %v727_v0 }
  0x9e   :  { %515 = vmatpush3.bf16.msra.mxu1 %v514_v46 }
  0x9f   :  { %516 = vmatprep.subr.bf16.mxu1 %v727_v0 }
  0xa0   :  { %494 = vmatpush3.bf16.msra.mxu0 %v493_v45 }
  0xa2   :  { %518 = vmatpush3.bf16.msra.mxu1 %v517_v52 }
  0xa3   :  { %422 = vmatmul.mubr.f32.vlgmr.msra.gmra.mrb[0].mxu0 %v114_v47 }
  0xa4   :  { %424 = vmatprep.mubr.msk.f32.mxu0 %vm728_vm0, %v729_v1 }
  0xa7   :  { %425 = vmatmul.mubr.f32.gmra.mrb[2].mxu0 %v115_v48 }
  0xa8   :  { %427 = vmatprep.mubr.msk.f32.mxu0 %vm728_vm0, %v729_v1 }
  0xab   :  { %428 = vmatmul.mubr.f32.gmra.mrb[4].mxu0 %v116_v49 }
 0x176   :  { %v206_v54 = vpop.f32.mrb[0].mxu0 }
 0x177   :  { %v207_v55 = vadd.f32 %v349_v53, %v206_v54  ;;  %v423_v56 = vpop.f32.mrb[1].mxu0 }
 0x179   :  { %v220_v57 = vmax.f32 %v207_v55, 0.0 }
 0x17a   :  { %v211_v58 = vpop.f32.mrb[2].mxu0 }
 0x17b   :  { %v212_v59 = vadd.f32 %v349_v53, %v211_v58  ;;  %v426_v60 = vpop.f32.mrb[3].mxu0  ;;  %463 = vmatmul.mubr.f32.vlgmr.msra.gmra.mrb[0].mxu1 %v220_v57 }
 0x17c   :  { %465 = vmatprep.mubr.msk.f32.mxu1 %vm728_vm0, %v729_v1 }
 0x17d   :  { %v221_v61 = vmax.f32 %v212_v59, 0.0 }
 0x17e   :  { %v216_v62 = vpop.f32.mrb[4].mxu0 }
 0x17f   :  { %v217_v63 = vadd.f32 %v349_v53, %v216_v62  ;;  %v429_v0 = vpop.f32.mrb[5].mxu0  ;;  %466 = vmatmul.mubr.f32.gmra.mrb[2].mxu1 %v221_v61 }
 0x180   :  { %468 = vmatprep.mubr.msk.f32.mxu1 %vm728_vm0, %v729_v1 }
 0x181   :  { %v222_v2 = vmax.f32 %v217_v63, 0.0 }
 0x183   :  { %469 = vmatmul.mubr.f32.gmra.mrb[4].mxu1 %v222_v2 }
 0x24e   :  { %v312_v4 = vpop.f32.mrb[0].mxu1 }
 0x24f   :  { %v313_v5 = vadd.f32 %v350_v3, %v312_v4  ;;  %v464_v6 = vpop.f32.mrb[1].mxu1 }
 0x251   :  { %326 = vst [vmem:[#allocation14] sm:$0xff] %v313_v5 }
 0x252   :  { %v317_v7 = vpop.f32.mrb[2].mxu1 }
 0x253   :  { %v318_v8 = vadd.f32 %v350_v3, %v317_v7  ;;  %v467_v9 = vpop.f32.mrb[3].mxu1 }
 0x255   :  { %327 = vst [vmem:[#allocation14 + $0x8] sm:$0xff] %v318_v8 }
 0x256   :  { %v322_v10 = vpop.f32.mrb[4].mxu1 }
 0x257   :  { %v323_v11 = vadd.f32 %v350_v3, %v322_v10  ;;  %v470_v12 = vpop.f32.mrb[5].mxu1 }
 0x259   :  { %328 = vst [vmem:[#allocation14 + $0x10] sm:$0xff] %v323_v11 }
 0x25a   :  { %697 = shalt.err (!%p694_p4)
}
 0x25b   :  { %s698_s20 = scalar_lea.hbm %s928_s7, 384 }
 0x25c   :  { %p699_p5 = scmp.ne.s32.totalorder %s928_s7, %s698_s20  ;;  %p702_p6 = scmp.lt.u32.totalorder %s698_s20, %s928_s7 }
 0x25e   :  { %p704_p7 = pnand %p702_p6, %p699_p5 }
 0x260   :  { %707 = shalt.err (!%p704_p7)
}
 0x261   :  { %340 = dma.vmem_to_hbm [thread:$0]  %s335_s30, 384, %s928_s7, [#allocation4], %s720_s13, %s720_s13, %s721_s14  }
 0x262   :  { %716 = dma.done.wait [#allocation4], 384  }
 0x263   :  { %717 = vsyncadd [#allocation4], 4294966912 }
 0x264   :  { %344 = vsyncpa [#allocation3], 1 }
 0x265   :  { %345 = vsyncpa [#allocation6], 1 }
 0x266   :  { %346 = vsyncpa [#allocation9], 1 }
 0x267   :  { %347 = vsyncpa [#allocation12], 1 }
 0x268   :  { %348 = vsyncpa [#allocation4], 1 }

</bundles_post_ra>
